<compile_context>
chip_gen: v5e
topology: v5e:2x2
jax: 0.10.0
libtpu: 0.0.40
codegen_flags: <defaults>
</compile_context>

<pallas_src>
import math

import jax
import jax.numpy as jnp
from jax import lax
from jax.experimental import pallas as pl
from jax.experimental.pallas import tpu as pltpu


def _pick_tile(dim, target, quantum):
    """Largest tile <= target that is a multiple of `quantum` and preferably
    divides `dim`; small dims use the full dim (allowed by the (8,128) rule)."""
    if dim <= target:
        return dim
    t = (target // quantum) * quantum
    cand = t
    while cand >= quantum:
        if dim % cand == 0:
            return cand
        cand -= quantum
    return t  # ragged last block; Pallas masks out-of-bounds reads/writes


def _vmem_limit(block_bytes):
    # double-buffered blocks + compiler slack, clamped under v7x's 64 MiB
    # physical VMEM (v5e/v6e have 128 MiB, so this is always safe).
    return int(min(max(3 * block_bytes + (4 << 20), 32 << 20), 60 << 20))


# ----------------------------------------------------------------------------
# Kernel 1: tiled "Linear" stage.
#   x1_ref   : (tm, D1)   rows = flattened (batch, len1), native width D1
#   wmm_ref  : (D1, tn)   main weight, columns grouped o-major (n = o*D2 + d2)
#   b0mm_ref : (1,  tn)   bias[0] row for the main columns (zeros if off)
#   wb1_ref  : (D1, O)    bias[1]-column weight rows (zeros if off)
#   b0b1_ref : (1,  O)    bias[0] x bias[1] corner constant
#   aff_ref  : (tm, tn)   affine main part (fp32 MXU accumulation)
#   affb_ref : (tm, O)    bias[1] column of the affine, per (i, o)
# ----------------------------------------------------------------------------
def _affine_kernel(x1_ref, wmm_ref, b0mm_ref, wb1_ref, b0b1_ref,
                   aff_ref, affb_ref):
    acc = jnp.dot(x1_ref[...], wmm_ref[...], preferred_element_type=jnp.float32)
    aff_ref[...] = (acc + b0mm_ref[...]).astype(aff_ref.dtype)

    @pl.when(pl.program_id(1) == 0)            # once per M tile
    def _():
        accb = jnp.dot(x1_ref[...], wb1_ref[...],
                       preferred_element_type=jnp.float32)
        affb_ref[...] = (accb + b0b1_ref[...]).astype(affb_ref.dtype)


# ----------------------------------------------------------------------------
# Kernel 2: tiled bilinear stage.
#   x2_ref   : (1, tL2, D2)   input2 tile (no ones column: bias[1] split out)
#   aff_ref  : (1, tN,  D2)   regrouped affine tile, rows k = i*O + o
#   affb_ref : (1, tN)        bias[1] column of the affine for those rows
#   o_ref    : (1, tL2, tN)   out[j, i*O+o]  (lane-dense, final memory order)
# ----------------------------------------------------------------------------
def _bilinear_kernel(x2_ref, aff_ref, affb_ref, o_ref):
    # A @ B^T form (D2 on the lane axis of both operands); per the perf review
    # this should take the MXU transposed-operand path.  If lower_as_mlir shows
    # a per-step vxpose of aff, restage aff (transpose once per N tile into a
    # VMEM scratch) instead.
    acc = lax.dot_general(
        x2_ref[0], aff_ref[0],
        dimension_numbers=(((1,), (1,)), ((), ())),
        preferred_element_type=jnp.float32)
    o_ref[0] = (acc + affb_ref[...]).astype(o_ref.dtype)


def biaffine_forward(input1, input2, weight, out_features, bias=(True, True),
                     compute_dtype=jnp.float32,
                     tm_target=512, tn1_target=512,
                     tl2_target=256, tn2_target=1024):
    """Pallas implementation of Biaffine.forward.

    input1: (B, L1, D1) f32, input2: (B, L2, D2) f32,
    weight: (out_features*(D2+bias[1]), D1+bias[0]) f32 (nn.Linear weight).
    returns (B, L2, L1, out_features) f32.

    compute_dtype=jnp.bfloat16 gives MXU-native throughput on v5e/v6e/v7x and
    halves HBM traffic for x1/W/x2 and the affine intermediate (accumulation
    stays fp32).  Default fp32 keeps bit-tight accuracy vs. the torch module.
    """
    B, L1, D1 = input1.shape
    Bb, L2, D2 = input2.shape
    assert B == Bb
    O = out_features
    D1p = D1 + int(bias[0])
    D2p = D2 + int(bias[1])
    assert weight.shape == (O * D2p, D1p), weight.shape
    f32 = jnp.float32

    # ---- one-time weight regrouping (tiny, wrapper-side) -------------------
    w4 = weight.reshape(O, D2p, D1p)
    if bias[1]:
        w_main = w4[:, :D2, :]                     # (O, D2, D1p)
        w_bcol = w4[:, D2, :]                      # (O, D1p) bias[1]-column rows
    else:
        w_main = w4
        w_bcol = jnp.zeros((O, D1p), f32)
    if bias[0]:
        w_mm = w_main[:, :, :D1]                   # (O, D2, D1)
        b0_mm = w_main[:, :, D1]                   # (O, D2)
        w_b1 = w_bcol[:, :D1]                      # (O, D1)
        b0_b1 = w_bcol[:, D1]                      # (O,)
    else:
        w_mm = w_main
        b0_mm = jnp.zeros((O, D2), f32)
        w_b1 = w_bcol
        b0_b1 = jnp.zeros((O,), f32)

    # kernel-1 N-axis columns are o-major: n = o*D2 + d2
    wmm_t = jnp.transpose(w_mm, (2, 0, 1)).reshape(D1, O * D2).astype(compute_dtype)
    b0mm_r = b0_mm.reshape(1, O * D2).astype(f32)
    wb1_t = jnp.transpose(w_b1).astype(compute_dtype)          # (D1, O)
    b0b1_r = b0_b1.reshape(1, O).astype(f32)

    x1_2d = input1.reshape(B * L1, D1).astype(compute_dtype)   # fold batch into M
    x2_3d = input2.astype(compute_dtype)                       # no ones column
    BM, N1 = B * L1, O * D2
    inter_dtype = compute_dtype

    # ---- kernel 1: affine = x1 @ Wmm (+ bias[0] row), tiled over M and N ---
    tm = _pick_tile(BM, tm_target, 8)
    tn1 = _pick_tile(N1, tn1_target, 128)
    grid1 = (pl.cdiv(BM, tm), pl.cdiv(N1, tn1))
    k1_block_bytes = 4 * (tm * D1 + D1 * tn1 + tn1 + D1 * O + O
                          + tm * tn1 + tm * O)
    cost1 = pl.CostEstimate(
        flops=2 * BM * D1 * (N1 + O), transcendentals=0,
        bytes_accessed=4 * (BM * D1 + D1 * (N1 + O) + BM * (N1 + O)))

    affine, affb = pl.pallas_call(
        _affine_kernel,
        out_shape=(jax.ShapeDtypeStruct((BM, N1), inter_dtype),
                   jax.ShapeDtypeStruct((BM, O), f32)),
        grid=grid1,
        in_specs=[
            pl.BlockSpec((tm, D1), lambda m, n: (m, 0)),
            pl.BlockSpec((D1, tn1), lambda m, n: (0, n)),
            pl.BlockSpec((1, tn1), lambda m, n: (0, n)),
            pl.BlockSpec((D1, O), lambda m, n: (0, 0)),
            pl.BlockSpec((1, O), lambda m, n: (0, 0)),
        ],
        out_specs=(pl.BlockSpec((tm, tn1), lambda m, n: (m, n)),
                   pl.BlockSpec((tm, O), lambda m, n: (m, 0))),
        compiler_params=pltpu.CompilerParams(
            dimension_semantics=("parallel", "arbitrary"),
            vmem_limit_bytes=_vmem_limit(k1_block_bytes)),
        cost_estimate=cost1,
    )(x1_2d, wmm_t, b0mm_r, wb1_t, b0b1_r)
    # TODO(synk): tile K (D1) with an fp32 VMEM accumulator + pl.when
    # init/finalize if D1 ever becomes large enough to stress VMEM.

    # (B*L1, O*D2) -> (B, L1*O, D2): row k = i*O + o, exactly torch's .view().
    # Not a pure bitcast for O > 1, so XLA may insert one relayout copy here.
    # TODO(synk): fuse the two stages into one kernel (needs an in-VMEM
    # (tL1, O*D2)->(tL1*O, D2) regroup that Mosaic does not reliably lower);
    # that would remove this HBM round trip entirely.
    affine = affine.reshape(B, L1 * O, D2)
    affb = affb.reshape(B, L1 * O)

    # ---- kernel 2: out[b, j, i*O+o] = x2[b,j,:] . affine[b,i*O+o,:] + affb --
    tl2 = _pick_tile(L2, tl2_target, 8)
    tn2 = _pick_tile(L1 * O, tn2_target, 128)
    grid2 = (B, pl.cdiv(L1 * O, tn2), pl.cdiv(L2, tl2))
    k2_block_bytes = 4 * (tl2 * D2 + tn2 * D2 + tn2 + tl2 * tn2)
    cost2 = pl.CostEstimate(
        flops=2 * B * L2 * (L1 * O) * D2, transcendentals=0,
        bytes_accessed=4 * B * (L2 * D2 + L1 * O * D2 + L1 * O + L2 * L1 * O))

    out = pl.pallas_call(
        _bilinear_kernel,
        out_shape=jax.ShapeDtypeStruct((B, L2, L1 * O), f32),
        grid=grid2,
        in_specs=[
            pl.BlockSpec((1, tl2, D2), lambda b, n, j: (b, j, 0)),
            pl.BlockSpec((1, tn2, D2), lambda b, n, j: (b, n, 0)),
            pl.BlockSpec((1, tn2), lambda b, n, j: (b, n)),
        ],
        out_specs=pl.BlockSpec((1, tl2, tn2), lambda b, n, j: (b, j, n)),
        compiler_params=pltpu.CompilerParams(
            dimension_semantics=("parallel", "parallel", "arbitrary"),
            vmem_limit_bytes=_vmem_limit(k2_block_bytes)),
        cost_estimate=cost2,
    )(x2_3d, affine, affb)
    # TODO(synk): for very small per-batch work, process several batch
    # elements per grid step to amortize the ~0.35us per-step overhead.

    # (B, L2, L1*O) -> (B, L2, L1, O): split of the contiguous minor axis,
    # identical to torch's final .contiguous().view(batch, len2, len1, O).
    return out.reshape(B, L2, L1, O)


def xavier_asymmetric_uniform_init(key, shape, gain=1.0):
    """Deterministic re-implementation of the module's weight init.
    shape = (fan_out, fan_in); uniform in [-a, a/3], a = sqrt(3)*gain*sqrt(2/(fi+fo))."""
    fan_out, fan_in = shape
    std = gain * math.sqrt(2.0 / float(fan_in + fan_out))
    a = math.sqrt(3.0) * std
    return jax.random.uniform(key, shape, jnp.float32, minval=-a, maxval=a / 3.0)


def _reference(input1, input2, weight, out_features, bias=(True, True)):
    """Pure-JAX mirror of the torch forward, for correctness checks."""
    B, L1, _ = input1.shape
    _, L2, _ = input2.shape
    x1, x2 = input1, input2
    if bias[0]:
        x1 = jnp.concatenate([x1, jnp.ones((B, L1, 1), x1.dtype)], axis=2)
    if bias[1]:
        x2 = jnp.concatenate([x2, jnp.ones((B, L2, 1), x2.dtype)], axis=2)
    affine = x1 @ weight.T                                    # (B, L1, O*D2p)
    affine = affine.reshape(B, L1 * out_features, x2.shape[-1])
    out = jnp.einsum("bkd,bjd->bjk", affine, x2)              # bmm + transpose(1,2)
    return out.reshape(B, L2, L1, out_features)


if __name__ == "__main__":
    B, L1, L2 = 2, 8, 8
    IN1, IN2, OUT = 32, 32, 4
    bias = (True, True)

    key = jax.random.PRNGKey(0)
    k1, k2, kw = jax.random.split(key, 3)
    input1 = jax.random.normal(k1, (B, L1, IN1), jnp.float32)
    input2 = jax.random.normal(k2, (B, L2, IN2), jnp.float32)
    weight = xavier_asymmetric_uniform_init(
        kw, (OUT * (IN2 + int(bias[1])), IN1 + int(bias[0])))

    ref = _reference(input1, input2, weight, OUT, bias)

    # fp32 path: tight check against the reference.
    out_f32 = biaffine_forward(input1, input2, weight, OUT, bias,
                               compute_dtype=jnp.float32)
    out_f32 = jax.block_until_ready(out_f32)
    assert out_f32.shape == (B, L2, L1, OUT), out_f32.shape
    err = float(jnp.max(jnp.abs(out_f32 - ref)))
    assert err < 1e-4, err

    # bf16 path (MXU-native on v5e/v6e/v7x, per perf review): loose check.
    out_bf16 = biaffine_forward(input1, input2, weight, OUT, bias,
                                compute_dtype=jnp.bfloat16)
    out_bf16 = jax.block_until_ready(out_bf16)
    err_bf16 = float(jnp.max(jnp.abs(out_bf16 - ref)))
    tol_bf16 = 0.05 * float(jnp.max(jnp.abs(ref))) + 0.05
    assert err_bf16 < tol_bf16, (err_bf16, tol_bf16)

    print("KERNEL_OK")
</pallas_src>

<mosaic_0001>
module attributes {stable_mosaic.version = 11 : i64} {
  func.func @_affine_kernel(%arg0: i32, %arg1: i32, %arg2: memref<16x32xf32, #tpu.memory_space<vmem>>, %arg3: memref<32x128xf32, #tpu.memory_space<vmem>>, %arg4: memref<1x128xf32, #tpu.memory_space<vmem>>, %arg5: memref<32x4xf32, #tpu.memory_space<vmem>>, %arg6: memref<1x4xf32, #tpu.memory_space<vmem>>, %arg7: memref<16x128xf32, #tpu.memory_space<vmem>>, %arg8: memref<16x4xf32, #tpu.memory_space<vmem>>) attributes {dimension_semantics = [#tpu.dimension_semantics<parallel>, #tpu.dimension_semantics<arbitrary>], iteration_bounds = array<i64: 1, 1>, scalar_prefetch = 0 : i64, scratch_operands = 0 : i64, tpu.core_type = #tpu.core_type<tc>, window_params = [{transform_indices = @transform_0, window_bounds = array<i64: 16, 32>}, {transform_indices = @transform_1, window_bounds = array<i64: 32, 128>}, {transform_indices = @transform_2, window_bounds = array<i64: 1, 128>}, {pipeline_mode = #tpu.pipeline_mode<synchronous>, transform_indices = @transform_3, window_bounds = array<i64: 32, 4>}, {pipeline_mode = #tpu.pipeline_mode<synchronous>, transform_indices = @transform_4, window_bounds = array<i64: 1, 4>}, {transform_indices = @transform_5, window_bounds = array<i64: 16, 128>}, {transform_indices = @transform_6, window_bounds = array<i64: 16, 4>}]} {
    %c0 = arith.constant 0 : index
    %c0_0 = arith.constant 0 : index
    %0 = vector.load %arg2[%c0, %c0_0] : memref<16x32xf32, #tpu.memory_space<vmem>>, vector<16x32xf32>
    %c0_1 = arith.constant 0 : index
    %c0_2 = arith.constant 0 : index
    %1 = vector.load %arg3[%c0_1, %c0_2] : memref<32x128xf32, #tpu.memory_space<vmem>>, vector<32x128xf32>
    %cst = arith.constant dense<0.000000e+00> : vector<16x128xf32>
    %2 = tpu.matmul %0, %1, %cst {dimension_numbers = #tpu.dot_dimension_numbers<[1], [0], [0], [1], [0, 0, 1, 1], [], []>} : vector<16x32xf32>, vector<32x128xf32>, vector<16x128xf32> -> vector<16x128xf32>
    %c0_3 = arith.constant 0 : index
    %c0_4 = arith.constant 0 : index
    %3 = vector.load %arg4[%c0_3, %c0_4] : memref<1x128xf32, #tpu.memory_space<vmem>>, vector<1x128xf32>
    %4 = vector.broadcast %3 : vector<1x128xf32> to vector<16x128xf32>
    %5 = arith.addf %2, %4 : vector<16x128xf32>
    %c0_5 = arith.constant 0 : index
    %c0_6 = arith.constant 0 : index
    %6 = vector.load %arg7[%c0_5, %c0_6] : memref<16x128xf32, #tpu.memory_space<vmem>>, vector<16x128xf32>
    tpu.vector_store %arg7[%c0_5, %c0_6], %5 {strides = array<i32>} : memref<16x128xf32, #tpu.memory_space<vmem>>, vector<16x128xf32>,
    %c0_i32 = arith.constant 0 : i32
    %7 = arith.cmpi eq, %arg1, %c0_i32 : i32
    %8 = arith.extui %7 : i1 to i32
    %c0_i32_7 = arith.constant 0 : i32
    %9 = arith.cmpi ne, %8, %c0_i32_7 : i32
    scf.if %9 {
      %c0_8 = arith.constant 0 : index
      %c0_9 = arith.constant 0 : index
      %10 = vector.load %arg2[%c0_8, %c0_9] : memref<16x32xf32, #tpu.memory_space<vmem>>, vector<16x32xf32>
      %c0_10 = arith.constant 0 : index
      %c0_11 = arith.constant 0 : index
      %11 = vector.load %arg5[%c0_10, %c0_11] : memref<32x4xf32, #tpu.memory_space<vmem>>, vector<32x4xf32>
      %cst_12 = arith.constant dense<0.000000e+00> : vector<16x4xf32>
      %12 = tpu.matmul %10, %11, %cst_12 {dimension_numbers = #tpu.dot_dimension_numbers<[1], [0], [0], [1], [0, 0, 1, 1], [], []>} : vector<16x32xf32>, vector<32x4xf32>, vector<16x4xf32> -> vector<16x4xf32>
      %c0_13 = arith.constant 0 : index
      %c0_14 = arith.constant 0 : index
      %13 = vector.load %arg6[%c0_13, %c0_14] : memref<1x4xf32, #tpu.memory_space<vmem>>, vector<1x4xf32>
      %14 = vector.broadcast %13 : vector<1x4xf32> to vector<16x4xf32>
      %15 = arith.addf %12, %14 : vector<16x4xf32>
      %c0_15 = arith.constant 0 : index
      %c0_16 = arith.constant 0 : index
      %16 = vector.load %arg8[%c0_15, %c0_16] : memref<16x4xf32, #tpu.memory_space<vmem>>, vector<16x4xf32>
      tpu.vector_store %arg8[%c0_15, %c0_16], %15 {strides = array<i32>} : memref<16x4xf32, #tpu.memory_space<vmem>>, vector<16x4xf32>,
    } else {
    }
    return
  }
  func.func @transform_0(%arg0: i32, %arg1: i32) -> (i32, i32) {
    %c0_i32 = arith.constant 0 : i32
    %c0_i32_0 = arith.constant 0 : i32
    return %arg0, %c0_i32 : i32, i32
  }
  func.func @transform_1(%arg0: i32, %arg1: i32) -> (i32, i32) {
    %c0_i32 = arith.constant 0 : i32
    %c0_i32_0 = arith.constant 0 : i32
    return %c0_i32, %arg1 : i32, i32
  }
  func.func @transform_2(%arg0: i32, %arg1: i32) -> (i32, i32) {
    %c0_i32 = arith.constant 0 : i32
    %c0_i32_0 = arith.constant 0 : i32
    return %c0_i32, %arg1 : i32, i32
  }
  func.func @transform_3(%arg0: i32, %arg1: i32) -> (i32, i32) {
    %c0_i32 = arith.constant 0 : i32
    %c0_i32_0 = arith.constant 0 : i32
    %c0_i32_1 = arith.constant 0 : i32
    return %c0_i32, %c0_i32_0 : i32, i32
  }
  func.func @transform_4(%arg0: i32, %arg1: i32) -> (i32, i32) {
    %c0_i32 = arith.constant 0 : i32
    %c0_i32_0 = arith.constant 0 : i32
    %c0_i32_1 = arith.constant 0 : i32
    return %c0_i32, %c0_i32_0 : i32, i32
  }
  func.func @transform_5(%arg0: i32, %arg1: i32) -> (i32, i32) {
    %c0_i32 = arith.constant 0 : i32
    return %arg0, %arg1 : i32, i32
  }
  func.func @transform_6(%arg0: i32, %arg1: i32) -> (i32, i32) {
    %c0_i32 = arith.constant 0 : i32
    %c0_i32_0 = arith.constant 0 : i32
    return %arg0, %c0_i32 : i32, i32
  }
}

</mosaic_0001>

<bundles_post_ra>
// kernel: tpu_custom_call.1
= control target key start
LH: loop header
LB: loop body
LE: loop exit
PB: predicated region body
PF: predicated region fallthrough
CT: control target
= control target key end

     0   :  { %12 = vsyncpa [#allocation3], 0  ;;  %s307_s0 = inlined_call_operand.hbm [shape: f32[16,32], index: 0, kind: input, shape index: {}]   ;;  %s308_s1 = inlined_call_operand.vmem [shape: f32[32,128], index: 1, kind: input, shape index: {}]   ;;  %s309_s2 = inlined_call_operand.vmem [shape: f32[1,128], index: 2, kind: input, shape index: {}]   ;;  %s310_s3 = inlined_call_operand.vmem [shape: f32[32,4], index: 3, kind: input, shape index: {}]   ;;  %s311_s4 = inlined_call_operand.vmem [shape: f32[1,4], index: 4, kind: input, shape index: {}]   ;;  %s312_s5 = inlined_call_operand.hbm [shape: f32[16,128], index: 5, kind: output, shape index: {0}]   ;;  %s313_s6 = inlined_call_operand.vmem [shape: f32[16,4], index: 6, kind: output, shape index: {1}]  }
   0x1   :  { %13 = vsyncpa [#allocation4], 0  ;;  %s18_s23 = sshll.u32 %s307_s0, 4  ;;  %s220_s24 = smov [#allocation2]   ;;  %s19_s23 = int_to_ptr.hbm [resolvable:$true] %s18_s23 }
   0x2   :  { %s20_s25 = sshll.u32 %s220_s24, 4  ;;  %s221_s26 = smov 128   ;;  %s21_s25 = int_to_ptr.vmem [resolvable:$true] %s20_s25 }
   0x3   :  { %s222_s27 = smov 8  }
   0x4   :  { %26 = dma.hbm_to_vmem [thread:$0]  %s19_s23, 256, %s21_s25, [#allocation3], %s221_s26, %s221_s26, %s222_s27  }
   0x5   :  { %216 = dma.done.wait [#allocation3], 256  }
   0x6   :  { %217 = vsyncadd [#allocation3], 4294967040  ;;  %v44_v0 = vld [vmem:[%s308_s1 + $0x18] sm:$0xff]  ;;  %v43_v2 = vld [vmem:[%s308_s1 + $0x10] sm:$0xff]  ;;  %vm49_vm0 = vcmask 261120   ;;  %vm124_vm1 = vcmask 31744  }
   0x7   :  { %v90_v1 = vld [vmem:[%s310_s3 + $0x18] sm:$0xff]  ;;  %154 = vmatpush.msra.mxu2 %v44_v0  ;;  %v89_v3 = vld [vmem:[%s310_s3 + $0x10] sm:$0xff]  ;;  %v42_v4 = vld [vmem:[%s308_s1 + $0x8] sm:$0xff]  ;;  %68 = vmatpush.msra.mxu0 %v44_v0  ;;  %s223_s21 = smov [#allocation5]   ;;  %s133_s25 = sshll.u32 %s312_s5, 4  ;;  %s134_s25 = int_to_ptr.hbm [resolvable:$true] %s133_s25 }
   0x8   :  { %158 = vmatpush.msra.mxu3 %v90_v1  ;;  %v88_v5 = vld [vmem:[%s310_s3 + $0x8] sm:$0xff]  ;;  %113 = vmatpush.msra.mxu1 %v90_v1  ;;  %v41_v6 = vld [vmem:[%s308_s1] sm:$0xff]  ;;  %s131_s22 = sshll.u32 %s223_s21, 4  ;;  %s132_s22 = int_to_ptr.vmem [resolvable:$true] %s131_s22 }
   0x9   :  { %155 = vmatpush.msra.mxu2 %v43_v2  ;;  %v87_v7 = vld [vmem:[%s310_s3] sm:$0xff]  ;;  %69 = vmatpush.msra.mxu0 %v43_v2  ;;  %v40_v8 = vld [vmem:[#allocation2 + $0x8] sm:$0xff] }
   0xa   :  { %159 = vmatpush.msra.mxu3 %v89_v3  ;;  %114 = vmatpush.msra.mxu1 %v89_v3  ;;  %v39_v9 = vld [vmem:[#allocation2] sm:$0xff] }
   0xb   :  { %156 = vmatpush.msra.mxu2 %v42_v4  ;;  %70 = vmatpush.msra.mxu0 %v42_v4  ;;  %v166_v10 = vld [vmem:[%s309_s2] ss:$0 sm:$0xff] }
   0xc   :  { %160 = vmatpush.msra.mxu3 %v88_v5  ;;  %115 = vmatpush.msra.mxu1 %v88_v5  ;;  %v167_v11 = vld [vmem:[%s311_s4] ss:$0 sm:$0xff] }
   0xd   :  { %157 = vmatpush.msra.mxu2 %v41_v6  ;;  %71 = vmatpush.msra.mxu0 %v41_v6 }
   0xe   :  { %161 = vmatpush.msra.mxu3 %v87_v7  ;;  %151 = vmatmul.msk.f32.vlgmr.msra.gmra.mxu2 %vm49_vm0, %v40_v8 }
   0xf   :  { %153 = vmatmul.msk.f32.vlgmr.msra.gmra.mxu3 %vm49_vm0, %v40_v8  ;;  %116 = vmatpush.msra.mxu1 %v87_v7 }
  0x10   :  { %150 = vmatmul.msk.f32.vlgmr.msra.gmra.mxu0 %vm49_vm0, %v39_v9  ;;  %152 = vmatmul.msk.f32.vlgmr.msra.gmra.mxu1 %vm49_vm0, %v39_v9 }
  0x8d   :  { %v73_v12 = vpop.f32.mrf.mxu0  ;;  %v118_v13 = vpop.f32.mrf.mxu1 }
  0x8e   :  { %v74_v14 = vadd.f32 %v166_v10, %v73_v12  ;;  %v119_v15 = vadd.f32 %v167_v11, %v118_v13 }
  0x90   :  { %79 = vst [vmem:[#allocation5] sm:$0xff] %v74_v14 }
  0x91   :  { %v76_v16 = vpop.f32.mrf.mxu2  ;;  %125 = vst.msk [vmem:[%s313_s6] sm:$0xff] %vm124_vm1, %v119_v15 }
  0x92   :  { %v121_v17 = vpop.f32.mrf.mxu3  ;;  %v77_v18 = vadd.f32 %v166_v10, %v76_v16 }
  0x93   :  { %v122_v19 = vadd.f32 %v167_v11, %v121_v17 }
  0x94   :  { %80 = vst [vmem:[#allocation5 + $0x8] sm:$0xff] %v77_v18 }
  0x95   :  { %126 = vst.msk [vmem:[%s313_s6 + $0x8] sm:$0xff] %vm124_vm1, %v122_v19 }
  0x96   :  { %139 = dma.vmem_to_hbm [thread:$0]  %s132_s22, 256, %s134_s25, [#allocation4], %s221_s26, %s221_s26, %s222_s27  }
  0x97   :  { %218 = dma.done.wait [#allocation4], 256  }
  0x98   :  { %219 = vsyncadd [#allocation4], 4294967040 }
  0x99   :  { %148 = vsyncpa [#allocation3], 1 }
  0x9a   :  { %149 = vsyncpa [#allocation4], 1 }

</bundles_post_ra>
